<compile_context>
chip_gen: v5e
topology: v5e:2x2
jax: 0.10.0
libtpu: 0.0.40
codegen_flags: <defaults>
</compile_context>

<pallas_src>
import functools

import jax
import jax.numpy as jnp
from jax.experimental import pallas as pl
from jax.experimental.pallas import tpu as pltpu

FEAT = 128


def mlp_kernel(x_ref,
               w1_ref, b1_ref,
               w2_ref, b2_ref,
               w3_ref, b3_ref,
               w4_ref, b4_ref,
               w5_ref, b5_ref,
               wf_ref, bf_ref,
               o_ref):
    """One batch tile of the fused MLP forward."""
    x = x_ref[...].astype(jnp.float32)                       # (TILE_B, 1)

    # ---- layer 1: (B,1) @ (1,128) is a degenerate matmul -> VPU broadcast.
    h = x * w1_ref[...].astype(jnp.float32) + b1_ref[...].astype(jnp.float32)
    h = jnp.maximum(h, 0.0)                                   # (TILE_B, 128)

    def linear_relu(h, w_ref, b_ref):
        y = jnp.dot(h.astype(w_ref.dtype), w_ref[...],
                    preferred_element_type=jnp.float32)
        y = y + b_ref[...].astype(jnp.float32)
        return jnp.maximum(y, 0.0)

    # ---- layers 2..5: 128x128 MXU matmuls, f32 accumulate.
    h = linear_relu(h, w2_ref, b2_ref)
    h = linear_relu(h, w3_ref, b3_ref)
    h = linear_relu(h, w4_ref, b4_ref)
    h = linear_relu(h, w5_ref, b5_ref)

    # ---- final layer: (B,128) @ (128,1) -> elementwise mul + lane reduction
    #      (keeps the MXU free, avoids a 1-lane matmul result).
    wf = wf_ref[...].astype(jnp.float32)                      # (1, 128)
    out = jnp.sum(h * wf, axis=-1, keepdims=True) + bf_ref[0]  # (TILE_B, 1)
    o_ref[...] = out.astype(o_ref.dtype)


def mlp_forward(x, params, *, tile_b=128, compute_dtype=jnp.float32):
    """x: (B, 1) float32.  params: list of (W_t (in,out), b (out,)) fp32."""
    B = x.shape[0]
    (w1, b1), (w2, b2), (w3, b3), (w4, b4), (w5, b5), (wf, bf) = params

    # Pad batch to a multiple of the tile so every grid step is full.
    num_tiles = (B + tile_b - 1) // tile_b
    Bp = num_tiles * tile_b
    x_p = jnp.pad(x, ((0, Bp - B), (0, 0))) if Bp != B else x
    x_p = x_p.astype(compute_dtype)

    def prep_w(w):
        return w.astype(compute_dtype)

    def prep_b(b):
        return b.reshape(1, -1).astype(jnp.float32)           # lane-full row

    flat = [
        prep_w(w1.reshape(1, FEAT)), prep_b(b1),
        prep_w(w2), prep_b(b2),
        prep_w(w3), prep_b(b3),
        prep_w(w4), prep_b(b4),
        prep_w(w5), prep_b(b5),
        prep_w(wf.reshape(FEAT, 1).T.reshape(1, FEAT)),        # (1,128) row
        bf.reshape(1).astype(jnp.float32),                     # scalar in SMEM
    ]

    # Weights / biases: constant index_map -> fetched once, VMEM-resident.
    def const_spec(shape):
        return pl.BlockSpec(shape, lambda i: (0, 0))

    in_specs = [
        pl.BlockSpec((tile_b, 1), lambda i: (i, 0)),           # x
        const_spec((1, FEAT)), const_spec((1, FEAT)),          # w1 row, b1
        const_spec((FEAT, FEAT)), const_spec((1, FEAT)),       # w2, b2
        const_spec((FEAT, FEAT)), const_spec((1, FEAT)),       # w3, b3
        const_spec((FEAT, FEAT)), const_spec((1, FEAT)),       # w4, b4
        const_spec((FEAT, FEAT)), const_spec((1, FEAT)),       # w5, b5
        const_spec((1, FEAT)),                                 # wf row
        pl.BlockSpec(memory_space=pltpu.MemorySpace.SMEM),     # bf scalar
    ]
    out_spec = pl.BlockSpec((tile_b, 1), lambda i: (i, 0))

    itemsize = jnp.dtype(compute_dtype).itemsize
    param_bytes = sum(int(a.size) * a.dtype.itemsize for a in flat)
    bytes_accessed = int(Bp) * itemsize + int(Bp) * 4 + param_bytes
    flops = 2 * Bp * FEAT * FEAT * 4 + 2 * Bp * FEAT * 2      # 4 dense + ends
    cost = pl.CostEstimate(flops=flops, transcendentals=0,
                           bytes_accessed=bytes_accessed)

    out = pl.pallas_call(
        mlp_kernel,
        out_shape=jax.ShapeDtypeStruct((Bp, 1), jnp.float32),
        grid=(num_tiles,),
        in_specs=in_specs,
        out_specs=out_spec,
        compiler_params=pltpu.CompilerParams(
            dimension_semantics=("parallel",)),
        cost_estimate=cost,
    )(x_p, *flat)

    return out[:B] if Bp != B else out


def init_params(key):
    """Deterministic init mimicking torch.nn.Linear (uniform +/- 1/sqrt(fan_in)).

    Returns list of (W_transposed (in, out), bias (out,)) in fp32.
    """
    dims = [(1, 128), (128, 128), (128, 128), (128, 128), (128, 128), (128, 1)]
    params = []
    for (fan_in, fan_out) in dims:
        key, kw, kb = jax.random.split(key, 3)
        bound = 1.0 / (fan_in ** 0.5)
        w_t = jax.random.uniform(kw, (fan_in, fan_out), jnp.float32,
                                 minval=-bound, maxval=bound)
        b = jax.random.uniform(kb, (fan_out,), jnp.float32,
                               minval=-bound, maxval=bound)
        params.append((w_t, b))
    return params


def reference_forward(x, params):
    h = x
    for i, (w_t, b) in enumerate(params):
        h = h @ w_t + b
        if i < len(params) - 1:
            h = jnp.maximum(h, 0.0)
    return h


if __name__ == "__main__":
    key = jax.random.PRNGKey(0)
    key, kx = jax.random.split(key)
    B = 8
    x = jax.random.normal(kx, (B, 1), jnp.float32)

    params = init_params(key)

    # fp32 path for the correctness check (use compute_dtype=jnp.bfloat16 on
    # v6e/v7x for throughput; expect ~1e-2 rel error in that mode).
    out = mlp_forward(x, params, tile_b=128, compute_dtype=jnp.float32)
    out = jax.block_until_ready(out)

    ref = reference_forward(x, params)
    assert out.shape == (B, 1), out.shape
    assert jnp.allclose(out, ref, atol=1e-5, rtol=1e-5), (out, ref)

    print("KERNEL_OK")
</pallas_src>

<mosaic_0001>
module attributes {stable_mosaic.version = 11 : i64} {
  func.func @mlp_kernel(%arg0: i32, %arg1: memref<128x1xf32, #tpu.memory_space<vmem>>, %arg2: memref<1x128xf32, #tpu.memory_space<vmem>>, %arg3: memref<1x128xf32, #tpu.memory_space<vmem>>, %arg4: memref<128x128xf32, #tpu.memory_space<vmem>>, %arg5: memref<1x128xf32, #tpu.memory_space<vmem>>, %arg6: memref<128x128xf32, #tpu.memory_space<vmem>>, %arg7: memref<1x128xf32, #tpu.memory_space<vmem>>, %arg8: memref<128x128xf32, #tpu.memory_space<vmem>>, %arg9: memref<1x128xf32, #tpu.memory_space<vmem>>, %arg10: memref<128x128xf32, #tpu.memory_space<vmem>>, %arg11: memref<1x128xf32, #tpu.memory_space<vmem>>, %arg12: memref<1x128xf32, #tpu.memory_space<vmem>>, %arg13: memref<1xf32, #tpu.memory_space<smem>>, %arg14: memref<128x1xf32, #tpu.memory_space<vmem>>) attributes {dimension_semantics = [#tpu.dimension_semantics<parallel>], iteration_bounds = array<i64: 1>, scalar_prefetch = 0 : i64, scratch_operands = 0 : i64, tpu.core_type = #tpu.core_type<tc>, window_params = [{transform_indices = @transform_0, window_bounds = array<i64: 128, 1>}, {pipeline_mode = #tpu.pipeline_mode<synchronous>, transform_indices = @transform_1, window_bounds = array<i64: 1, 128>}, {pipeline_mode = #tpu.pipeline_mode<synchronous>, transform_indices = @transform_2, window_bounds = array<i64: 1, 128>}, {pipeline_mode = #tpu.pipeline_mode<synchronous>, transform_indices = @transform_3, window_bounds = array<i64: 128, 128>}, {pipeline_mode = #tpu.pipeline_mode<synchronous>, transform_indices = @transform_4, window_bounds = array<i64: 1, 128>}, {pipeline_mode = #tpu.pipeline_mode<synchronous>, transform_indices = @transform_5, window_bounds = array<i64: 128, 128>}, {pipeline_mode = #tpu.pipeline_mode<synchronous>, transform_indices = @transform_6, window_bounds = array<i64: 1, 128>}, {pipeline_mode = #tpu.pipeline_mode<synchronous>, transform_indices = @transform_7, window_bounds = array<i64: 128, 128>}, {pipeline_mode = #tpu.pipeline_mode<synchronous>, transform_indices = @transform_8, window_bounds = array<i64: 1, 128>}, {pipeline_mode = #tpu.pipeline_mode<synchronous>, transform_indices = @transform_9, window_bounds = array<i64: 128, 128>}, {pipeline_mode = #tpu.pipeline_mode<synchronous>, transform_indices = @transform_10, window_bounds = array<i64: 1, 128>}, {pipeline_mode = #tpu.pipeline_mode<synchronous>, transform_indices = @transform_11, window_bounds = array<i64: 1, 128>}, {transform_indices = @transform_12, window_bounds = array<i64: 1>}, {transform_indices = @transform_13, window_bounds = array<i64: 128, 1>}]} {
    %c0 = arith.constant 0 : index
    %c0_0 = arith.constant 0 : index
    %0 = vector.load %arg1[%c0, %c0_0] : memref<128x1xf32, #tpu.memory_space<vmem>>, vector<128x1xf32>
    %c0_1 = arith.constant 0 : index
    %c0_2 = arith.constant 0 : index
    %1 = vector.load %arg2[%c0_1, %c0_2] : memref<1x128xf32, #tpu.memory_space<vmem>>, vector<1x128xf32>
    %2 = vector.broadcast %0 : vector<128x1xf32> to vector<128x128xf32>
    %3 = vector.broadcast %1 : vector<1x128xf32> to vector<128x128xf32>
    %4 = arith.mulf %2, %3 : vector<128x128xf32>
    %c0_3 = arith.constant 0 : index
    %c0_4 = arith.constant 0 : index
    %5 = vector.load %arg3[%c0_3, %c0_4] : memref<1x128xf32, #tpu.memory_space<vmem>>, vector<1x128xf32>
    %6 = vector.broadcast %5 : vector<1x128xf32> to vector<128x128xf32>
    %7 = arith.addf %4, %6 : vector<128x128xf32>
    %cst = arith.constant 0.000000e+00 : f32
    %8 = vector.broadcast %cst : f32 to vector<128x128xf32>
    %9 = arith.maximumf %7, %8 : vector<128x128xf32>
    %c0_5 = arith.constant 0 : index
    %c0_6 = arith.constant 0 : index
    %10 = vector.load %arg4[%c0_5, %c0_6] : memref<128x128xf32, #tpu.memory_space<vmem>>, vector<128x128xf32>
    %cst_7 = arith.constant dense<0.000000e+00> : vector<128x128xf32>
    %11 = tpu.matmul %9, %10, %cst_7 {dimension_numbers = #tpu.dot_dimension_numbers<[1], [0], [0], [1], [0, 0, 1, 1], [], []>} : vector<128x128xf32>, vector<128x128xf32>, vector<128x128xf32> -> vector<128x128xf32>
    %c0_8 = arith.constant 0 : index
    %c0_9 = arith.constant 0 : index
    %12 = vector.load %arg5[%c0_8, %c0_9] : memref<1x128xf32, #tpu.memory_space<vmem>>, vector<1x128xf32>
    %13 = vector.broadcast %12 : vector<1x128xf32> to vector<128x128xf32>
    %14 = arith.addf %11, %13 : vector<128x128xf32>
    %cst_10 = arith.constant 0.000000e+00 : f32
    %15 = vector.broadcast %cst_10 : f32 to vector<128x128xf32>
    %16 = arith.maximumf %14, %15 : vector<128x128xf32>
    %c0_11 = arith.constant 0 : index
    %c0_12 = arith.constant 0 : index
    %17 = vector.load %arg6[%c0_11, %c0_12] : memref<128x128xf32, #tpu.memory_space<vmem>>, vector<128x128xf32>
    %cst_13 = arith.constant dense<0.000000e+00> : vector<128x128xf32>
    %18 = tpu.matmul %16, %17, %cst_13 {dimension_numbers = #tpu.dot_dimension_numbers<[1], [0], [0], [1], [0, 0, 1, 1], [], []>} : vector<128x128xf32>, vector<128x128xf32>, vector<128x128xf32> -> vector<128x128xf32>
    %c0_14 = arith.constant 0 : index
    %c0_15 = arith.constant 0 : index
    %19 = vector.load %arg7[%c0_14, %c0_15] : memref<1x128xf32, #tpu.memory_space<vmem>>, vector<1x128xf32>
    %20 = vector.broadcast %19 : vector<1x128xf32> to vector<128x128xf32>
    %21 = arith.addf %18, %20 : vector<128x128xf32>
    %cst_16 = arith.constant 0.000000e+00 : f32
    %22 = vector.broadcast %cst_16 : f32 to vector<128x128xf32>
    %23 = arith.maximumf %21, %22 : vector<128x128xf32>
    %c0_17 = arith.constant 0 : index
    %c0_18 = arith.constant 0 : index
    %24 = vector.load %arg8[%c0_17, %c0_18] : memref<128x128xf32, #tpu.memory_space<vmem>>, vector<128x128xf32>
    %cst_19 = arith.constant dense<0.000000e+00> : vector<128x128xf32>
    %25 = tpu.matmul %23, %24, %cst_19 {dimension_numbers = #tpu.dot_dimension_numbers<[1], [0], [0], [1], [0, 0, 1, 1], [], []>} : vector<128x128xf32>, vector<128x128xf32>, vector<128x128xf32> -> vector<128x128xf32>
    %c0_20 = arith.constant 0 : index
    %c0_21 = arith.constant 0 : index
    %26 = vector.load %arg9[%c0_20, %c0_21] : memref<1x128xf32, #tpu.memory_space<vmem>>, vector<1x128xf32>
    %27 = vector.broadcast %26 : vector<1x128xf32> to vector<128x128xf32>
    %28 = arith.addf %25, %27 : vector<128x128xf32>
    %cst_22 = arith.constant 0.000000e+00 : f32
    %29 = vector.broadcast %cst_22 : f32 to vector<128x128xf32>
    %30 = arith.maximumf %28, %29 : vector<128x128xf32>
    %c0_23 = arith.constant 0 : index
    %c0_24 = arith.constant 0 : index
    %31 = vector.load %arg10[%c0_23, %c0_24] : memref<128x128xf32, #tpu.memory_space<vmem>>, vector<128x128xf32>
    %cst_25 = arith.constant dense<0.000000e+00> : vector<128x128xf32>
    %32 = tpu.matmul %30, %31, %cst_25 {dimension_numbers = #tpu.dot_dimension_numbers<[1], [0], [0], [1], [0, 0, 1, 1], [], []>} : vector<128x128xf32>, vector<128x128xf32>, vector<128x128xf32> -> vector<128x128xf32>
    %c0_26 = arith.constant 0 : index
    %c0_27 = arith.constant 0 : index
    %33 = vector.load %arg11[%c0_26, %c0_27] : memref<1x128xf32, #tpu.memory_space<vmem>>, vector<1x128xf32>
    %34 = vector.broadcast %33 : vector<1x128xf32> to vector<128x128xf32>
    %35 = arith.addf %32, %34 : vector<128x128xf32>
    %cst_28 = arith.constant 0.000000e+00 : f32
    %36 = vector.broadcast %cst_28 : f32 to vector<128x128xf32>
    %37 = arith.maximumf %35, %36 : vector<128x128xf32>
    %c0_29 = arith.constant 0 : index
    %c0_30 = arith.constant 0 : index
    %38 = vector.load %arg12[%c0_29, %c0_30] : memref<1x128xf32, #tpu.memory_space<vmem>>, vector<1x128xf32>
    %39 = vector.broadcast %38 : vector<1x128xf32> to vector<128x128xf32>
    %40 = arith.mulf %37, %39 : vector<128x128xf32>
    %cst_31 = arith.constant dense<0.000000e+00> : vector<128xf32>
    %41 = vector.multi_reduction <add>, %40, %cst_31 [1] : vector<128x128xf32> to vector<128xf32>
    %42 = vector.shape_cast %41 : vector<128xf32> to vector<128x1xf32>
    %c0_32 = arith.constant 0 : index
    %43 = memref.load %arg13[%c0_32] : memref<1xf32, #tpu.memory_space<smem>>
    %44 = vector.broadcast %43 : f32 to vector<128x1xf32>
    %45 = arith.addf %42, %44 : vector<128x1xf32>
    %c0_33 = arith.constant 0 : index
    %c0_34 = arith.constant 0 : index
    %46 = vector.load %arg14[%c0_33, %c0_34] : memref<128x1xf32, #tpu.memory_space<vmem>>, vector<128x1xf32>
    tpu.vector_store %arg14[%c0_33, %c0_34], %45 {strides = array<i32>} : memref<128x1xf32, #tpu.memory_space<vmem>>, vector<128x1xf32>,
    return
  }
  func.func @transform_0(%arg0: i32) -> (i32, i32) {
    %c0_i32 = arith.constant 0 : i32
    %c0_i32_0 = arith.constant 0 : i32
    return %arg0, %c0_i32 : i32, i32
  }
  func.func @transform_1(%arg0: i32) -> (i32, i32) {
    %c0_i32 = arith.constant 0 : i32
    %c0_i32_0 = arith.constant 0 : i32
    %c0_i32_1 = arith.constant 0 : i32
    return %c0_i32, %c0_i32_0 : i32, i32
  }
  func.func @transform_2(%arg0: i32) -> (i32, i32) {
    %c0_i32 = arith.constant 0 : i32
    %c0_i32_0 = arith.constant 0 : i32
    %c0_i32_1 = arith.constant 0 : i32
    return %c0_i32, %c0_i32_0 : i32, i32
  }
  func.func @transform_3(%arg0: i32) -> (i32, i32) {
    %c0_i32 = arith.constant 0 : i32
    %c0_i32_0 = arith.constant 0 : i32
    %c0_i32_1 = arith.constant 0 : i32
    return %c0_i32, %c0_i32_0 : i32, i32
  }
  func.func @transform_4(%arg0: i32) -> (i32, i32) {
    %c0_i32 = arith.constant 0 : i32
    %c0_i32_0 = arith.constant 0 : i32
    %c0_i32_1 = arith.constant 0 : i32
    return %c0_i32, %c0_i32_0 : i32, i32
  }
  func.func @transform_5(%arg0: i32) -> (i32, i32) {
    %c0_i32 = arith.constant 0 : i32
    %c0_i32_0 = arith.constant 0 : i32
    %c0_i32_1 = arith.constant 0 : i32
    return %c0_i32, %c0_i32_0 : i32, i32
  }
  func.func @transform_6(%arg0: i32) -> (i32, i32) {
    %c0_i32 = arith.constant 0 : i32
    %c0_i32_0 = arith.constant 0 : i32
    %c0_i32_1 = arith.constant 0 : i32
    return %c0_i32, %c0_i32_0 : i32, i32
  }
  func.func @transform_7(%arg0: i32) -> (i32, i32) {
    %c0_i32 = arith.constant 0 : i32
    %c0_i32_0 = arith.constant 0 : i32
    %c0_i32_1 = arith.constant 0 : i32
    return %c0_i32, %c0_i32_0 : i32, i32
  }
  func.func @transform_8(%arg0: i32) -> (i32, i32) {
    %c0_i32 = arith.constant 0 : i32
    %c0_i32_0 = arith.constant 0 : i32
    %c0_i32_1 = arith.constant 0 : i32
    return %c0_i32, %c0_i32_0 : i32, i32
  }
  func.func @transform_9(%arg0: i32) -> (i32, i32) {
    %c0_i32 = arith.constant 0 : i32
    %c0_i32_0 = arith.constant 0 : i32
    %c0_i32_1 = arith.constant 0 : i32
    return %c0_i32, %c0_i32_0 : i32, i32
  }
  func.func @transform_10(%arg0: i32) -> (i32, i32) {
    %c0_i32 = arith.constant 0 : i32
    %c0_i32_0 = arith.constant 0 : i32
    %c0_i32_1 = arith.constant 0 : i32
    return %c0_i32, %c0_i32_0 : i32, i32
  }
  func.func @transform_11(%arg0: i32) -> (i32, i32) {
    %c0_i32 = arith.constant 0 : i32
    %c0_i32_0 = arith.constant 0 : i32
    %c0_i32_1 = arith.constant 0 : i32
    return %c0_i32, %c0_i32_0 : i32, i32
  }
  func.func @transform_12(%arg0: i32) -> i32 {
    %c0_i32 = arith.constant 0 : i32
    %c0_i32_0 = arith.constant 0 : i32
    return %c0_i32 : i32
  }
  func.func @transform_13(%arg0: i32) -> (i32, i32) {
    %c0_i32 = arith.constant 0 : i32
    %c0_i32_0 = arith.constant 0 : i32
    return %arg0, %c0_i32 : i32, i32
  }
}

</mosaic_0001>

<bundles_post_ra>
// kernel: tpu_custom_call.1
= control target key start
LH: loop header
LB: loop body
LE: loop exit
PB: predicated region body
PF: predicated region fallthrough
CT: control target
= control target key end

     0   :  { %19 = vsyncpa [#allocation4], 0  ;;  %s1180_s0 = inlined_call_operand.vmem [shape: f32[128,1], index: 0, kind: input, shape index: {}]   ;;  %s1181_s1 = inlined_call_operand.vmem [shape: f32[1,128], index: 1, kind: input, shape index: {}]   ;;  %s1182_s2 = inlined_call_operand.vmem [shape: f32[1,128], index: 2, kind: input, shape index: {}]   ;;  %s1183_s3 = inlined_call_operand.vmem [shape: f32[128,128], index: 3, kind: input, shape index: {}]   ;;  %s1184_s4 = inlined_call_operand.vmem [shape: f32[1,128], index: 4, kind: input, shape index: {}]   ;;  %s1185_s5 = inlined_call_operand.hbm [shape: f32[128,128], index: 5, kind: input, shape index: {}]   ;;  %s1186_s6 = inlined_call_operand.vmem [shape: f32[1,128], index: 6, kind: input, shape index: {}]   ;;  %s1187_s7 = inlined_call_operand.hbm [shape: f32[128,128], index: 7, kind: input, shape index: {}]   ;;  %s1188_s8 = inlined_call_operand.vmem [shape: f32[1,128], index: 8, kind: input, shape index: {}]   ;;  %s1189_s9 = inlined_call_operand.hbm [shape: f32[128,128], index: 9, kind: input, shape index: {}]   ;;  %s1190_s10 = inlined_call_operand.vmem [shape: f32[1,128], index: 10, kind: input, shape index: {}]   ;;  %s1191_s11 = inlined_call_operand.vmem [shape: f32[1,128], index: 11, kind: input, shape index: {}]   ;;  %s1192_s12 = inlined_call_operand.<no memory space> [shape: f32[1], index: 12, kind: input, shape index: {}]   ;;  %s1193_s13 = inlined_call_operand.vmem [shape: f32[128,1], index: 13, kind: output, shape index: {}]  }
   0x1   :  { %20 = vsyncpa [#allocation6], 0  ;;  %s50_s27 = sshll.u32 %s1187_s7, 4  ;;  %s833_s28 = smov [#allocation5]   ;;  %s51_s27 = int_to_ptr.hbm [resolvable:$true] %s50_s27 }
   0x2   :  { %s52_s29 = sshll.u32 %s833_s28, 4  ;;  %s35_s15 = sshll.u32 %s1185_s5, 4  ;;  %s53_s29 = int_to_ptr.vmem [resolvable:$true] %s52_s29  ;;  %s36_s15 = int_to_ptr.hbm [resolvable:$true] %s35_s15 }
   0x3   :  { %s834_s16 = smov 128   ;;  %s835_s17 = smov 8  }
   0x4   :  { %58 = dma.hbm_to_vmem [thread:$0]  %s51_s27, 2048, %s53_s29, [#allocation6], %s834_s16, %s834_s16, %s835_s17  }
   0x5   :  { %s836_s18 = smov [#allocation3]   ;;  %s65_s22 = sshll.u32 %s1189_s9, 4  ;;  %s66_s22 = int_to_ptr.hbm [resolvable:$true] %s65_s22 }
   0x6   :  { %s37_s19 = sshll.u32 %s836_s18, 4  ;;  %s837_s7 = smov [#allocation7]   ;;  %s38_s19 = int_to_ptr.vmem [resolvable:$true] %s37_s19 }
   0x7   :  { %43 = dma.hbm_to_vmem [thread:$0]  %s36_s15, 2048, %s38_s19, [#allocation4], %s834_s16, %s834_s16, %s835_s17  }
   0x8   :  { %s67_s23 = sshll.u32 %s837_s7, 4  ;;  %s68_s23 = int_to_ptr.vmem [resolvable:$true] %s67_s23 }
   0x9   :  { %73 = dma.hbm_to_vmem [thread:$0]  %s66_s22, 2048, %s68_s23, [#allocation6], %s834_s16, %s834_s16, %s835_s17  }
   0xa   :  { %829 = dma.done.wait [#allocation4], 2048  }
   0xb   :  { %830 = vsyncadd [#allocation4], 4294965248 }
   0xc   :  { %831 = dma.done.wait [#allocation6], 4096  }
   0xd   :  { %832 = vsyncadd [#allocation6], 4294963200  ;;  %v838_v0 = vmov 0   ;;  %v94_v1 = vld [vmem:[%s1180_s0 + $0x10] sm:$0xff]  ;;  %v92_v2 = vld [vmem:[%s1180_s0] sm:$0xff]  ;;  %vm718_vm0 = vcmask 7168  }
   0xe   :  { %748 = vset.pattern.permute.xlu1 %v838_v0  ;;  %747 = vset.pattern.permute.xlu0 %v838_v0  ;;  %v96_v3 = vld [vmem:[%s1180_s0 + $0x20] sm:$0xff]  ;;  %v95_v4 = vld [vmem:[%s1180_s0 + $0x18] sm:$0xff]  ;;  %v93_v5 = vld [vmem:[%s1180_s0 + $0x8] sm:$0xff] }
   0xf   :  { %749 = vset.pattern.permute.xlu2 %v838_v0  ;;  %121 = vperm.xlu1 %748, %v94_v1   ;;  %v97_v6 = vld [vmem:[%s1180_s0 + $0x28] sm:$0xff]  ;;  %v259_v7 = vld [vmem:[%s1183_s3 + $0x78] sm:$0xff]  ;;  %v258_v8 = vld [vmem:[%s1183_s3 + $0x70] sm:$0xff] }
  0x10   :  { %111 = vperm.xlu0 %747, %v92_v2   ;;  %131 = vperm.xlu2 %749, %v96_v3   ;;  %v257_v9 = vld [vmem:[%s1183_s3 + $0x68] sm:$0xff]  ;;  %v256_v10 = vld [vmem:[%s1183_s3 + $0x60] sm:$0xff]  ;;  %v99_v11 = vld [vmem:[%s1180_s0 + $0x38] sm:$0xff] }
  0x11   :  { %264 = vmatpush.msra.mxu0 %v259_v7  ;;  %v98_v12 = vld [vmem:[%s1180_s0 + $0x30] sm:$0xff]  ;;  %v255_v13 = vld [vmem:[%s1183_s3 + $0x58] sm:$0xff]  ;;  %v100_v14 = vld [vmem:[%s1180_s0 + $0x40] sm:$0xff] }
  0x12   :  { %v254_v15 = vld [vmem:[%s1183_s3 + $0x50] sm:$0xff]  ;;  %v253_v16 = vld [vmem:[%s1183_s3 + $0x48] sm:$0xff]  ;;  %v252_v17 = vld [vmem:[%s1183_s3 + $0x40] sm:$0xff] }
  0x13   :  { %265 = vmatpush.msra.mxu0 %v258_v8  ;;  %v102_v18 = vld [vmem:[%s1180_s0 + $0x50] sm:$0xff]  ;;  %v101_v19 = vld [vmem:[%s1180_s0 + $0x48] sm:$0xff]  ;;  %v251_v20 = vld [vmem:[%s1183_s3 + $0x38] sm:$0xff] }
  0x14   :  { %v103_v21 = vld [vmem:[%s1180_s0 + $0x58] sm:$0xff]  ;;  %v250_v22 = vld [vmem:[%s1183_s3 + $0x30] sm:$0xff]  ;;  %v249_v23 = vld [vmem:[%s1183_s3 + $0x28] sm:$0xff] }
  0x15   :  { %266 = vmatpush.msra.mxu0 %v257_v9  ;;  %v248_v24 = vld [vmem:[%s1183_s3 + $0x20] sm:$0xff]  ;;  %v105_v25 = vld [vmem:[%s1180_s0 + $0x68] sm:$0xff]  ;;  %v247_v27 = vld [vmem:[%s1183_s3 + $0x18] sm:$0xff] }
  0x16   :  { %v104_v26 = vld [vmem:[%s1180_s0 + $0x60] sm:$0xff]  ;;  %v106_v28 = vld [vmem:[%s1180_s0 + $0x70] sm:$0xff]  ;;  %v107_v29 = vld [vmem:[%s1180_s0 + $0x78] sm:$0xff] }
  0x17   :  { %126 = vperm.xlu1 %748, %v95_v4   ;;  %267 = vmatpush.msra.mxu0 %v256_v10  ;;  %v246_v30 = vld [vmem:[%s1183_s3 + $0x10] sm:$0xff]  ;;  %v245_v31 = vld [vmem:[%s1183_s3 + $0x8] sm:$0xff]  ;;  %v244_v32 = vld [vmem:[%s1183_s3] sm:$0xff] }
  0x18   :  { %116 = vperm.xlu0 %747, %v93_v5   ;;  %136 = vperm.xlu2 %749, %v97_v6   ;;  %v750_v36 = vld [vmem:[%s1181_s1] ss:$0 sm:$0xff] }
  0x19   :  { %268 = vmatpush.msra.mxu0 %v255_v13  ;;  %v751_v37 = vld [vmem:[%s1182_s2] ss:$0 sm:$0xff] }
  0x1b   :  { %269 = vmatpush.msra.mxu0 %v254_v15 }
  0x1d   :  { %270 = vmatpush.msra.mxu0 %v253_v16 }
  0x1f   :  { %146 = vperm.xlu1 %748, %v99_v11   ;;  %271 = vmatpush.msra.mxu0 %v252_v17 }
  0x20   :  { %141 = vperm.xlu0 %747, %v98_v12   ;;  %151 = vperm.xlu2 %749, %v100_v14  }
  0x21   :  { %272 = vmatpush.msra.mxu0 %v251_v20 }
  0x23   :  { %273 = vmatpush.msra.mxu0 %v250_v22 }
  0x25   :  { %274 = vmatpush.msra.mxu0 %v249_v23 }
  0x27   :  { %161 = vperm.xlu1 %748, %v102_v18   ;;  %275 = vmatpush.msra.mxu0 %v248_v24 }
  0x28   :  { %156 = vperm.xlu0 %747, %v101_v19   ;;  %166 = vperm.xlu2 %749, %v103_v21  }
  0x29   :  { %276 = vmatpush.msra.mxu0 %v247_v27 }
  0x2b   :  { %277 = vmatpush.msra.mxu0 %v246_v30  ;;  %v358_v30 = vld [vmem:[#allocation3 + $0x68] sm:$0xff] }
  0x2d   :  { %278 = vmatpush.msra.mxu0 %v245_v31 }
  0x2f   :  { %176 = vperm.xlu1 %748, %v105_v25   ;;  %279 = vmatpush.msra.mxu0 %v244_v32  ;;  %v357_v32 = vld [vmem:[#allocation3 + $0x60] sm:$0xff] }
  0x30   :  { %171 = vperm.xlu0 %747, %v104_v26   ;;  %181 = vperm.xlu2 %749, %v106_v28   ;;  %v360_v28 = vld [vmem:[#allocation3 + $0x78] sm:$0xff] }
  0x31   :  { %365 = vmatpush.msra.mxu1 %v360_v28  ;;  %v454_v28 = vld [vmem:[#allocation5 + $0x40] sm:$0xff] }
  0x38   :  { %186 = vperm.xlu0 %747, %v107_v29   ;;  %v359_v29 = vld [vmem:[#allocation3 + $0x70] sm:$0xff] }
  0x39   :  { %366 = vmatpush.msra.mxu1 %v359_v29  ;;  %v453_v29 = vld [vmem:[#allocation5 + $0x38] sm:$0xff] }
  0x3b   :  { %367 = vmatpush.msra.mxu1 %v358_v30 }
  0x3d   :  { %368 = vmatpush.msra.mxu1 %v357_v32  ;;  %v452_v32 = vld [vmem:[#allocation5 + $0x30] sm:$0xff] }
  0x6a   :  { %v132_v33 = vpop.permute.xlu2 %131 }
  0x6b   :  { %v196_v3 = vmul.f32 %v750_v36, %v132_v33  ;;  %v356_v33 = vld [vmem:[#allocation3 + $0x58] sm:$0xff] }
  0x6c   :  { %369 = vmatpush.msra.mxu1 %v356_v33 }
  0x6d   :  { %v216_v7 = vadd.f32 %v751_v37, %v196_v3 }
  0x6f   :  { %v232_v12 = vmax.f32 %v216_v7, 0.0 }
  0x72   :  { %v137_v34 = vpop.permute.xlu2 %136 }
  0x73   :  { %v197_v15 = vmul.f32 %v750_v36, %v137_v34  ;;  %v355_v34 = vld [vmem:[#allocation3 + $0x50] sm:$0xff] }
  0x74   :  { %370 = vmatpush.msra.mxu1 %v355_v34  ;;  %v451_v34 = vld [vmem:[#allocation5 + $0x28] sm:$0xff] }
  0x75   :  { %v217_v18 = vadd.f32 %v751_v37, %v197_v15  ;;  %v461_v15 = vld [vmem:[#allocation5 + $0x78] sm:$0xff] }
  0x76   :  { %466 = vmatpush.msra.mxu2 %v461_v15 }
  0x77   :  { %v233_v21 = vmax.f32 %v217_v18, 0.0  ;;  %v460_v18 = vld [vmem:[#allocation5 + $0x70] sm:$0xff] }
  0x78   :  { %467 = vmatpush.msra.mxu2 %v460_v18 }
  0x7a   :  { %v152_v35 = vpop.permute.xlu2 %151 }
  0x7b   :  { %v200_v40 = vmul.f32 %v750_v36, %v152_v35  ;;  %v354_v35 = vld [vmem:[#allocation3 + $0x48] sm:$0xff] }
  0x7c   :  { %371 = vmatpush.msra.mxu1 %v354_v35  ;;  %v450_v35 = vld [vmem:[#allocation5 + $0x20] sm:$0xff] }
  0x7d   :  { %v220_v45 = vadd.f32 %v751_v37, %v200_v40  ;;  %v350_v40 = vld [vmem:[#allocation3 + $0x28] sm:$0xff] }
  0x7f   :  { %v236_v27 = vmax.f32 %v220_v45, 0.0 }
  0x81   :  { %v122_v38 = vpop.permute.xlu1 %121 }
  0x82   :  { %v112_v39 = vpop.permute.xlu0 %111  ;;  %v167_v42 = vpop.permute.xlu2 %166  ;;  %v194_v52 = vmul.f32 %v750_v36, %v122_v38  ;;  %v352_v38 = vld [vmem:[#allocation3 + $0x38] sm:$0xff] }
  0x83   :  { %v192_v41 = vmul.f32 %v750_v36, %v112_v39  ;;  %v203_v44 = vmul.f32 %v750_v36, %v167_v42  ;;  %v351_v39 = vld [vmem:[#allocation3 + $0x30] sm:$0xff]  ;;  %v349_v42 = vld [vmem:[#allocation3 + $0x20] sm:$0xff] }
  0x84   :  { %v214_v57 = vadd.f32 %v751_v37, %v194_v52 }
  0x85   :  { %v212_v43 = vadd.f32 %v751_v37, %v192_v41  ;;  %v1020_v47 = vadd.f32 %v751_v37, %v203_v44  ;;  %v347_v44 = vld [vmem:[#allocation3 + $0x10] sm:$0xff] }
  0x86   :  { %v230_v60 = vmax.f32 %v214_v57, 0.0 }
  0x87   :  { %v228_v46 = vmax.f32 %v212_v43, 0.0  ;;  %v239_v41 = vmax.f32 %v1020_v47, 0.0  ;;  %v348_v43 = vld [vmem:[#allocation3 + $0x18] sm:$0xff] }
  0x89   :  { %280 = vmatmul.f32.vlgmr.msra.gmra.mxu0 %v228_v46  ;;  %v127_v48 = vpop.permute.xlu1 %126  ;;  %v346_v46 = vld [vmem:[#allocation3 + $0x8] sm:$0xff] }
  0x8a   :  { %v117_v49 = vpop.permute.xlu0 %116  ;;  %v182_v51 = vpop.permute.xlu2 %181  ;;  %v195_v61 = vmul.f32 %v750_v36, %v127_v48  ;;  %v345_v48 = vld [vmem:[#allocation3] sm:$0xff] }
  0x8b   :  { %v193_v50 = vmul.f32 %v750_v36, %v117_v49  ;;  %v206_v54 = vmul.f32 %v750_v36, %v182_v51  ;;  %v1029_v51 = vld [vmem:[%s1184_s4] ss:$0 sm:$0xff] }
  0x8c   :  { %v215_v2 = vadd.f32 %v751_v37, %v195_v61 }
  0x8d   :  { %v213_v53 = vadd.f32 %v751_v37, %v193_v50  ;;  %v1022_v56 = vadd.f32 %v751_v37, %v206_v54 }
  0x8e   :  { %v231_v6 = vmax.f32 %v215_v2, 0.0 }
  0x8f   :  { %v229_v55 = vmax.f32 %v213_v53, 0.0  ;;  %v242_v50 = vmax.f32 %v1022_v56, 0.0 }
  0x91   :  { %283 = vmatmul.f32.gmra.mxu0 %v229_v55  ;;  %v147_v58 = vpop.permute.xlu1 %146 }
  0x92   :  { %v142_v59 = vpop.permute.xlu0 %141  ;;  %v199_v23 = vmul.f32 %v750_v36, %v147_v58 }
  0x93   :  { %v198_v20 = vmul.f32 %v750_v36, %v142_v59 }
  0x94   :  { %v219_v25 = vadd.f32 %v751_v37, %v199_v23 }
  0x95   :  { %v218_v22 = vadd.f32 %v751_v37, %v198_v20  ;;  %v459_v20 = vld [vmem:[#allocation5 + $0x68] sm:$0xff] }
  0x96   :  { %v235_v26 = vmax.f32 %v219_v25, 0.0  ;;  %468 = vmatpush.msra.mxu2 %v459_v20  ;;  %v456_v25 = vld [vmem:[#allocation5 + $0x50] sm:$0xff] }
  0x97   :  { %v234_v24 = vmax.f32 %v218_v22, 0.0  ;;  %v457_v22 = vld [vmem:[#allocation5 + $0x58] sm:$0xff]  ;;  %v561_v20 = vld [vmem:[#allocation7 + $0x70] sm:$0xff] }
  0x99   :  { %286 = vmatmul.f32.gmra.mxu0 %v230_v60  ;;  %v162_v62 = vpop.permute.xlu1 %161 }
  0x9a   :  { %v157_v63 = vpop.permute.xlu0 %156  ;;  %v202_v0 = vmul.f32 %v750_v36, %v162_v62 }
  0x9b   :  { %v201_v1 = vmul.f32 %v750_v36, %v157_v63 }
  0x9c   :  { %v222_v5 = vadd.f32 %v751_v37, %v202_v0 }
  0x9d   :  { %v221_v4 = vadd.f32 %v751_v37, %v201_v1 }
  0x9f   :  { %v237_v31 = vmax.f32 %v221_v4, 0.0 }
  0xa1   :  { %289 = vmatmul.f32.gmra.mxu0 %v231_v6  ;;  %v177_v8 = vpop.permute.xlu1 %176 }
  0xa2   :  { %v172_v9 = vpop.permute.xlu0 %171  ;;  %v205_v10 = vmul.f32 %v750_v36, %v177_v8 }
  0xa3   :  { %v204_v11 = vmul.f32 %v750_v36, %v172_v9 }
  0xa4   :  { %v225_v14 = vadd.f32 %v751_v37, %v205_v10 }
  0xa5   :  { %v224_v13 = vadd.f32 %v751_v37, %v204_v11 }
  0xa6   :  { %v241_v49 = vmax.f32 %v225_v14, 0.0 }
  0xa7   :  { %v240_v45 = vmax.f32 %v224_v13, 0.0 }
  0xa9   :  { %292 = vmatmul.f32.gmra.mxu0 %v232_v12 }
  0xaa   :  { %v187_v16 = vpop.permute.xlu0 %186 }
  0xab   :  { %v207_v17 = vmul.f32 %v750_v36, %v187_v16  ;;  %v238_v36 = vmax.f32 %v222_v5, 0.0 }
  0xad   :  { %v227_v19 = vadd.f32 %v751_v37, %v207_v17  ;;  %v353_v37 = vld [vmem:[#allocation3 + $0x40] sm:$0xff] }
  0xae   :  { %372 = vmatpush.msra.mxu1 %v353_v37 }
  0xaf   :  { %v243_v47 = vmax.f32 %v227_v19, 0.0 }
  0xb0   :  { %373 = vmatpush.msra.mxu1 %v352_v38 }
  0xb1   :  { %295 = vmatmul.f32.gmra.mxu0 %v233_v21  ;;  %v458_v21 = vld [vmem:[#allocation5 + $0x60] sm:$0xff] }
  0xb2   :  { %374 = vmatpush.msra.mxu1 %v351_v39  ;;  %469 = vmatpush.msra.mxu2 %v458_v21  ;;  %v448_v39 = vld [vmem:[#allocation5 + $0x10] sm:$0xff] }
  0xb4   :  { %375 = vmatpush.msra.mxu1 %v350_v40  ;;  %470 = vmatpush.msra.mxu2 %v457_v22 }
  0xb6   :  { %376 = vmatpush.msra.mxu1 %v349_v42  ;;  %471 = vmatpush.msra.mxu2 %v456_v25  ;;  %v446_v42 = vld [vmem:[#allocation5] sm:$0xff] }
  0xb7   :  { %v559_v25 = vld [vmem:[#allocation7 + $0x60] sm:$0xff] }
  0xb8   :  { %377 = vmatpush.msra.mxu1 %v348_v43 }
  0xb9   :  { %298 = vmatmul.f32.gmra.mxu0 %v234_v24 }
  0xba   :  { %378 = vmatpush.msra.mxu1 %v347_v44 }
  0xbc   :  { %379 = vmatpush.msra.mxu1 %v346_v46 }
  0xbe   :  { %380 = vmatpush.msra.mxu1 %v345_v48 }
  0xc1   :  { %301 = vmatmul.f32.gmra.mxu0 %v235_v26 }
  0xc9   :  { %304 = vmatmul.f32.gmra.mxu0 %v236_v27  ;;  %v455_v27 = vld [vmem:[#allocation5 + $0x48] sm:$0xff] }
  0xca   :  { %472 = vmatpush.msra.mxu2 %v455_v27  ;;  %v557_v27 = vld [vmem:[#allocation7 + $0x50] sm:$0xff] }
  0xcc   :  { %473 = vmatpush.msra.mxu2 %v454_v28 }
  0xce   :  { %474 = vmatpush.msra.mxu2 %v453_v29 }
  0xd0   :  { %475 = vmatpush.msra.mxu2 %v452_v32  ;;  %v555_v32 = vld [vmem:[#allocation7 + $0x40] sm:$0xff] }
  0xd1   :  { %307 = vmatmul.f32.gmra.mxu0 %v237_v31 }
  0xd2   :  { %476 = vmatpush.msra.mxu2 %v451_v34  ;;  %v553_v34 = vld [vmem:[#allocation7 + $0x30] sm:$0xff] }
  0xd4   :  { %477 = vmatpush.msra.mxu2 %v450_v35  ;;  %v552_v35 = vld [vmem:[#allocation7 + $0x28] sm:$0xff] }
  0xd9   :  { %310 = vmatmul.f32.gmra.mxu0 %v238_v36  ;;  %v449_v36 = vld [vmem:[#allocation5 + $0x18] sm:$0xff] }
  0xda   :  { %478 = vmatpush.msra.mxu2 %v449_v36 }
  0xdc   :  { %479 = vmatpush.msra.mxu2 %v448_v39 }
  0xe1   :  { %313 = vmatmul.f32.gmra.mxu0 %v239_v41  ;;  %v447_v41 = vld [vmem:[#allocation5 + $0x8] sm:$0xff] }
  0xe2   :  { %480 = vmatpush.msra.mxu2 %v447_v41  ;;  %v549_v41 = vld [vmem:[#allocation7 + $0x10] sm:$0xff] }
  0xe4   :  { %481 = vmatpush.msra.mxu2 %v446_v42 }
  0xe9   :  { %316 = vmatmul.f32.gmra.mxu0 %v240_v45 }
  0xf1   :  { %319 = vmatmul.f32.gmra.mxu0 %v241_v49 }
  0xf9   :  { %322 = vmatmul.f32.gmra.mxu0 %v242_v50 }
 0x101   :  { %325 = vmatmul.f32.gmra.mxu0 %v243_v47 }
 0x106   :  { %v281_v52 = vpop.f32.mrf.mxu0 }
 0x107   :  { %v282_v53 = vadd.f32 %v1029_v51, %v281_v52 }
 0x109   :  { %v329_v54 = vmax.f32 %v282_v53, 0.0  ;;  %v1050_v53 = vld [vmem:[%s1186_s6] ss:$0 sm:$0xff] }
 0x10b   :  { %381 = vmatmul.f32.vlgmr.msra.gmra.mxu1 %v329_v54 }
 0x10e   :  { %v284_v55 = vpop.f32.mrf.mxu0 }
 0x10f   :  { %v285_v57 = vadd.f32 %v1029_v51, %v284_v55 }
 0x111   :  { %v330_v58 = vmax.f32 %v285_v57, 0.0 }
 0x113   :  { %384 = vmatmul.f32.gmra.mxu1 %v330_v58 }
 0x116   :  { %v287_v59 = vpop.f32.mrf.mxu0 }
 0x117   :  { %v288_v56 = vadd.f32 %v1029_v51, %v287_v59 }
 0x119   :  { %v331_v60 = vmax.f32 %v288_v56, 0.0 }
 0x11b   :  { %387 = vmatmul.f32.gmra.mxu1 %v331_v60 }
 0x11e   :  { %v290_v61 = vpop.f32.mrf.mxu0 }
 0x11f   :  { %v291_v62 = vadd.f32 %v1029_v51, %v290_v61 }
 0x121   :  { %v332_v63 = vmax.f32 %v291_v62, 0.0 }
 0x123   :  { %390 = vmatmul.f32.gmra.mxu1 %v332_v63 }
 0x126   :  { %v293_v0 = vpop.f32.mrf.mxu0 }
 0x127   :  { %v294_v1 = vadd.f32 %v1029_v51, %v293_v0 }
 0x129   :  { %v333_v2 = vmax.f32 %v294_v1, 0.0 }
 0x12b   :  { %393 = vmatmul.f32.gmra.mxu1 %v333_v2 }
 0x12e   :  { %v296_v3 = vpop.f32.mrf.mxu0 }
 0x12f   :  { %v297_v4 = vadd.f32 %v1029_v51, %v296_v3 }
 0x131   :  { %v334_v5 = vmax.f32 %v297_v4, 0.0 }
 0x133   :  { %396 = vmatmul.f32.gmra.mxu1 %v334_v5 }
 0x136   :  { %v299_v6 = vpop.f32.mrf.mxu0 }
 0x137   :  { %v300_v7 = vadd.f32 %v1029_v51, %v299_v6 }
 0x139   :  { %v335_v8 = vmax.f32 %v300_v7, 0.0 }
 0x13b   :  { %399 = vmatmul.f32.gmra.mxu1 %v335_v8 }
 0x13e   :  { %v302_v9 = vpop.f32.mrf.mxu0 }
 0x13f   :  { %v303_v10 = vadd.f32 %v1029_v51, %v302_v9 }
 0x141   :  { %v336_v11 = vmax.f32 %v303_v10, 0.0 }
 0x143   :  { %402 = vmatmul.f32.gmra.mxu1 %v336_v11 }
 0x146   :  { %v305_v12 = vpop.f32.mrf.mxu0 }
 0x147   :  { %v306_v13 = vadd.f32 %v1029_v51, %v305_v12 }
 0x149   :  { %v337_v14 = vmax.f32 %v306_v13, 0.0 }
 0x14b   :  { %405 = vmatmul.f32.gmra.mxu1 %v337_v14 }
 0x14e   :  { %v308_v16 = vpop.f32.mrf.mxu0 }
 0x14f   :  { %v309_v17 = vadd.f32 %v1029_v51, %v308_v16 }
 0x151   :  { %v338_v19 = vmax.f32 %v309_v17, 0.0 }
 0x153   :  { %408 = vmatmul.f32.gmra.mxu1 %v338_v19  ;;  %v562_v19 = vld [vmem:[#allocation7 + $0x78] sm:$0xff] }
 0x154   :  { %567 = vmatpush.msra.mxu3 %v562_v19 }
 0x156   :  { %v311_v23 = vpop.f32.mrf.mxu0  ;;  %568 = vmatpush.msra.mxu3 %v561_v20 }
 0x157   :  { %v312_v24 = vadd.f32 %v1029_v51, %v311_v23  ;;  %v560_v23 = vld [vmem:[#allocation7 + $0x68] sm:$0xff] }
 0x158   :  { %569 = vmatpush.msra.mxu3 %v560_v23 }
 0x159   :  { %v339_v26 = vmax.f32 %v312_v24, 0.0 }
 0x15a   :  { %570 = vmatpush.msra.mxu3 %v559_v25 }
 0x15b   :  { %411 = vmatmul.f32.gmra.mxu1 %v339_v26  ;;  %v558_v26 = vld [vmem:[#allocation7 + $0x58] sm:$0xff] }
 0x15c   :  { %571 = vmatpush.msra.mxu3 %v558_v26 }
 0x15e   :  { %v314_v30 = vpop.f32.mrf.mxu0  ;;  %572 = vmatpush.msra.mxu3 %v557_v27 }
 0x15f   :  { %v315_v31 = vadd.f32 %v1029_v51, %v314_v30  ;;  %v556_v30 = vld [vmem:[#allocation7 + $0x48] sm:$0xff] }
 0x160   :  { %573 = vmatpush.msra.mxu3 %v556_v30 }
 0x161   :  { %v340_v33 = vmax.f32 %v315_v31, 0.0 }
 0x162   :  { %574 = vmatpush.msra.mxu3 %v555_v32 }
 0x163   :  { %414 = vmatmul.f32.gmra.mxu1 %v340_v33  ;;  %v554_v33 = vld [vmem:[#allocation7 + $0x38] sm:$0xff] }
 0x164   :  { %575 = vmatpush.msra.mxu3 %v554_v33 }
 0x166   :  { %v317_v37 = vpop.f32.mrf.mxu0  ;;  %576 = vmatpush.msra.mxu3 %v553_v34 }
 0x167   :  { %v318_v38 = vadd.f32 %v1029_v51, %v317_v37 }
 0x168   :  { %577 = vmatpush.msra.mxu3 %v552_v35 }
 0x169   :  { %v341_v40 = vmax.f32 %v318_v38, 0.0  ;;  %v551_v38 = vld [vmem:[#allocation7 + $0x20] sm:$0xff] }
 0x16a   :  { %578 = vmatpush.msra.mxu3 %v551_v38  ;;  %v1074_v38 = vld [vmem:[%s1190_s10] ss:$0 sm:$0xff] }
 0x16b   :  { %417 = vmatmul.f32.gmra.mxu1 %v341_v40  ;;  %v550_v40 = vld [vmem:[#allocation7 + $0x18] sm:$0xff] }
 0x16c   :  { %579 = vmatpush.msra.mxu3 %v550_v40 }
 0x16e   :  { %v320_v43 = vpop.f32.mrf.mxu0  ;;  %580 = vmatpush.msra.mxu3 %v549_v41  ;;  %v1080_v41 = vld [vmem:[%s1191_s11] ss:$0 sm:$0xff] }
 0x16f   :  { %v321_v44 = vadd.f32 %v1029_v51, %v320_v43 }
 0x171   :  { %v342_v45 = vmax.f32 %v321_v44, 0.0  ;;  %v548_v44 = vld [vmem:[#allocation7 + $0x8] sm:$0xff] }
 0x172   :  { %581 = vmatpush.msra.mxu3 %v548_v44 }
 0x173   :  { %420 = vmatmul.f32.gmra.mxu1 %v342_v45 }
 0x176   :  { %v323_v46 = vpop.f32.mrf.mxu0 }
 0x177   :  { %v324_v48 = vadd.f32 %v1029_v51, %v323_v46  ;;  %v547_v46 = vld [vmem:[#allocation7] sm:$0xff] }
 0x178   :  { %582 = vmatpush.msra.mxu3 %v547_v46 }
 0x179   :  { %v343_v49 = vmax.f32 %v324_v48, 0.0 }
 0x17b   :  { %423 = vmatmul.f32.gmra.mxu1 %v343_v49 }
 0x17e   :  { %v326_v50 = vpop.f32.mrf.mxu0 }
 0x17f   :  { %v327_v47 = vadd.f32 %v1029_v51, %v326_v50 }
 0x181   :  { %v344_v52 = vmax.f32 %v327_v47, 0.0 }
 0x183   :  { %426 = vmatmul.f32.gmra.mxu1 %v344_v52 }
 0x188   :  { %v382_v54 = vpop.f32.mrf.mxu1 }
 0x189   :  { %v383_v55 = vadd.f32 %v1050_v53, %v382_v54 }
 0x18b   :  { %v430_v57 = vmax.f32 %v383_v55, 0.0  ;;  %v754_v55 = vld [vmem:[%s1188_s8] ss:$0 sm:$0xff] }
 0x18d   :  { %482 = vmatmul.f32.vlgmr.msra.gmra.mxu2 %v430_v57 }
 0x190   :  { %v385_v58 = vpop.f32.mrf.mxu1 }
 0x191   :  { %v386_v59 = vadd.f32 %v1050_v53, %v385_v58 }
 0x193   :  { %v431_v56 = vmax.f32 %v386_v59, 0.0 }
 0x195   :  { %485 = vmatmul.f32.gmra.mxu2 %v431_v56 }
 0x198   :  { %v388_v60 = vpop.f32.mrf.mxu1 }
 0x199   :  { %v389_v51 = vadd.f32 %v1050_v53, %v388_v60 }
 0x19b   :  { %v432_v61 = vmax.f32 %v389_v51, 0.0 }
 0x19d   :  { %488 = vmatmul.f32.gmra.mxu2 %v432_v61 }
 0x1a0   :  { %v391_v62 = vpop.f32.mrf.mxu1 }
 0x1a1   :  { %v392_v63 = vadd.f32 %v1050_v53, %v391_v62 }
 0x1a3   :  { %v433_v0 = vmax.f32 %v392_v63, 0.0 }
 0x1a5   :  { %491 = vmatmul.f32.gmra.mxu2 %v433_v0 }
 0x1a8   :  { %v394_v1 = vpop.f32.mrf.mxu1 }
 0x1a9   :  { %v395_v2 = vadd.f32 %v1050_v53, %v394_v1 }
 0x1ab   :  { %v434_v3 = vmax.f32 %v395_v2, 0.0 }
 0x1ad   :  { %494 = vmatmul.f32.gmra.mxu2 %v434_v3 }
 0x1b0   :  { %v397_v4 = vpop.f32.mrf.mxu1 }
 0x1b1   :  { %v398_v5 = vadd.f32 %v1050_v53, %v397_v4 }
 0x1b3   :  { %v435_v6 = vmax.f32 %v398_v5, 0.0 }
 0x1b5   :  { %497 = vmatmul.f32.gmra.mxu2 %v435_v6 }
 0x1b8   :  { %v400_v7 = vpop.f32.mrf.mxu1 }
 0x1b9   :  { %v401_v8 = vadd.f32 %v1050_v53, %v400_v7 }
 0x1bb   :  { %v436_v9 = vmax.f32 %v401_v8, 0.0 }
 0x1bd   :  { %500 = vmatmul.f32.gmra.mxu2 %v436_v9 }
 0x1c0   :  { %v403_v10 = vpop.f32.mrf.mxu1 }
 0x1c1   :  { %v404_v11 = vadd.f32 %v1050_v53, %v403_v10 }
 0x1c3   :  { %v437_v12 = vmax.f32 %v404_v11, 0.0 }
 0x1c5   :  { %503 = vmatmul.f32.gmra.mxu2 %v437_v12 }
 0x1c8   :  { %v406_v13 = vpop.f32.mrf.mxu1 }
 0x1c9   :  { %v407_v14 = vadd.f32 %v1050_v53, %v406_v13 }
 0x1cb   :  { %v438_v15 = vmax.f32 %v407_v14, 0.0 }
 0x1cd   :  { %506 = vmatmul.f32.gmra.mxu2 %v438_v15 }
 0x1d0   :  { %v409_v16 = vpop.f32.mrf.mxu1 }
 0x1d1   :  { %v410_v17 = vadd.f32 %v1050_v53, %v409_v16 }
 0x1d3   :  { %v439_v18 = vmax.f32 %v410_v17, 0.0 }
 0x1d5   :  { %509 = vmatmul.f32.gmra.mxu2 %v439_v18 }
 0x1d8   :  { %v412_v21 = vpop.f32.mrf.mxu1 }
 0x1d9   :  { %v413_v22 = vadd.f32 %v1050_v53, %v412_v21 }
 0x1db   :  { %v440_v24 = vmax.f32 %v413_v22, 0.0 }
 0x1dd   :  { %512 = vmatmul.f32.gmra.mxu2 %v440_v24 }
 0x1e0   :  { %v415_v28 = vpop.f32.mrf.mxu1 }
 0x1e1   :  { %v416_v29 = vadd.f32 %v1050_v53, %v415_v28 }
 0x1e3   :  { %v441_v31 = vmax.f32 %v416_v29, 0.0 }
 0x1e5   :  { %515 = vmatmul.f32.gmra.mxu2 %v441_v31 }
 0x1e8   :  { %v418_v36 = vpop.f32.mrf.mxu1 }
 0x1e9   :  { %v419_v37 = vadd.f32 %v1050_v53, %v418_v36 }
 0x1eb   :  { %v442_v39 = vmax.f32 %v419_v37, 0.0 }
 0x1ed   :  { %518 = vmatmul.f32.gmra.mxu2 %v442_v39 }
 0x1f0   :  { %v421_v42 = vpop.f32.mrf.mxu1 }
 0x1f1   :  { %v422_v43 = vadd.f32 %v1050_v53, %v421_v42 }
 0x1f3   :  { %v443_v45 = vmax.f32 %v422_v43, 0.0 }
 0x1f5   :  { %521 = vmatmul.f32.gmra.mxu2 %v443_v45 }
 0x1f8   :  { %v424_v48 = vpop.f32.mrf.mxu1 }
 0x1f9   :  { %v425_v49 = vadd.f32 %v1050_v53, %v424_v48 }
 0x1fb   :  { %v444_v50 = vmax.f32 %v425_v49, 0.0 }
 0x1fd   :  { %524 = vmatmul.f32.gmra.mxu2 %v444_v50 }
 0x200   :  { %v427_v47 = vpop.f32.mrf.mxu1 }
 0x201   :  { %v428_v52 = vadd.f32 %v1050_v53, %v427_v47 }
 0x203   :  { %v445_v54 = vmax.f32 %v428_v52, 0.0 }
 0x205   :  { %527 = vmatmul.f32.gmra.mxu2 %v445_v54 }
 0x210   :  { %v483_v57 = vpop.f32.mrf.mxu2 }
 0x211   :  { %v484_v58 = vadd.f32 %v754_v55, %v483_v57 }
 0x213   :  { %v531_v59 = vmax.f32 %v484_v58, 0.0 }
 0x215   :  { %583 = vmatmul.f32.vlgmr.msra.gmra.mxu3 %v531_v59 }
 0x218   :  { %v486_v56 = vpop.f32.mrf.mxu2 }
 0x219   :  { %v487_v60 = vadd.f32 %v754_v55, %v486_v56 }
 0x21b   :  { %v532_v51 = vmax.f32 %v487_v60, 0.0 }
 0x21d   :  { %586 = vmatmul.f32.gmra.mxu3 %v532_v51 }
 0x220   :  { %v489_v61 = vpop.f32.mrf.mxu2 }
 0x221   :  { %v490_v62 = vadd.f32 %v754_v55, %v489_v61 }
 0x223   :  { %v533_v63 = vmax.f32 %v490_v62, 0.0 }
 0x225   :  { %589 = vmatmul.f32.gmra.mxu3 %v533_v63 }
 0x228   :  { %v492_v0 = vpop.f32.mrf.mxu2 }
 0x229   :  { %v493_v53 = vadd.f32 %v754_v55, %v492_v0 }
 0x22b   :  { %v534_v1 = vmax.f32 %v493_v53, 0.0 }
 0x22d   :  { %592 = vmatmul.f32.gmra.mxu3 %v534_v1 }
 0x230   :  { %v495_v2 = vpop.f32.mrf.mxu2 }
 0x231   :  { %v496_v3 = vadd.f32 %v754_v55, %v495_v2 }
 0x233   :  { %v535_v4 = vmax.f32 %v496_v3, 0.0 }
 0x235   :  { %595 = vmatmul.f32.gmra.mxu3 %v535_v4 }
 0x238   :  { %v498_v5 = vpop.f32.mrf.mxu2 }
 0x239   :  { %v499_v6 = vadd.f32 %v754_v55, %v498_v5 }
 0x23b   :  { %v536_v7 = vmax.f32 %v499_v6, 0.0 }
 0x23d   :  { %598 = vmatmul.f32.gmra.mxu3 %v536_v7 }
 0x240   :  { %v501_v8 = vpop.f32.mrf.mxu2 }
 0x241   :  { %v502_v9 = vadd.f32 %v754_v55, %v501_v8 }
 0x243   :  { %v537_v10 = vmax.f32 %v502_v9, 0.0 }
 0x245   :  { %601 = vmatmul.f32.gmra.mxu3 %v537_v10 }
 0x248   :  { %v504_v11 = vpop.f32.mrf.mxu2 }
 0x249   :  { %v505_v12 = vadd.f32 %v754_v55, %v504_v11 }
 0x24b   :  { %v538_v13 = vmax.f32 %v505_v12, 0.0 }
 0x24d   :  { %604 = vmatmul.f32.gmra.mxu3 %v538_v13 }
 0x250   :  { %v507_v14 = vpop.f32.mrf.mxu2 }
 0x251   :  { %v508_v15 = vadd.f32 %v754_v55, %v507_v14 }
 0x253   :  { %v539_v16 = vmax.f32 %v508_v15, 0.0 }
 0x255   :  { %607 = vmatmul.f32.gmra.mxu3 %v539_v16 }
 0x258   :  { %v510_v17 = vpop.f32.mrf.mxu2 }
 0x259   :  { %v511_v18 = vadd.f32 %v754_v55, %v510_v17 }
 0x25b   :  { %v540_v19 = vmax.f32 %v511_v18, 0.0 }
 0x25d   :  { %610 = vmatmul.f32.gmra.mxu3 %v540_v19 }
 0x260   :  { %v513_v20 = vpop.f32.mrf.mxu2 }
 0x261   :  { %v514_v21 = vadd.f32 %v754_v55, %v513_v20 }
 0x263   :  { %v541_v22 = vmax.f32 %v514_v21, 0.0 }
 0x265   :  { %613 = vmatmul.f32.gmra.mxu3 %v541_v22 }
 0x268   :  { %v516_v23 = vpop.f32.mrf.mxu2 }
 0x269   :  { %v517_v24 = vadd.f32 %v754_v55, %v516_v23 }
 0x26b   :  { %v542_v25 = vmax.f32 %v517_v24, 0.0 }
 0x26d   :  { %616 = vmatmul.f32.gmra.mxu3 %v542_v25 }
 0x270   :  { %v519_v26 = vpop.f32.mrf.mxu2 }
 0x271   :  { %v520_v27 = vadd.f32 %v754_v55, %v519_v26 }
 0x273   :  { %v543_v28 = vmax.f32 %v520_v27, 0.0 }
 0x275   :  { %619 = vmatmul.f32.gmra.mxu3 %v543_v28 }
 0x278   :  { %v522_v29 = vpop.f32.mrf.mxu2 }
 0x279   :  { %v523_v30 = vadd.f32 %v754_v55, %v522_v29 }
 0x27b   :  { %v544_v31 = vmax.f32 %v523_v30, 0.0 }
 0x27d   :  { %622 = vmatmul.f32.gmra.mxu3 %v544_v31 }
 0x280   :  { %v525_v32 = vpop.f32.mrf.mxu2 }
 0x281   :  { %v526_v33 = vadd.f32 %v754_v55, %v525_v32 }
 0x283   :  { %v545_v34 = vmax.f32 %v526_v33, 0.0 }
 0x285   :  { %625 = vmatmul.f32.gmra.mxu3 %v545_v34 }
 0x288   :  { %v528_v35 = vpop.f32.mrf.mxu2 }
 0x289   :  { %v529_v36 = vadd.f32 %v754_v55, %v528_v35 }
 0x28b   :  { %v546_v37 = vmax.f32 %v529_v36, 0.0 }
 0x28d   :  { %628 = vmatmul.f32.gmra.mxu3 %v546_v37  ;;  %v701_v37 = vstv %s1192_s12 }
 0x298   :  { %v584_v39 = vpop.f32.mrf.mxu3 }
 0x299   :  { %v585_v40 = vadd.f32 %v1074_v38, %v584_v39 }
 0x29b   :  { %v632_v42 = vmax.f32 %v585_v40, 0.0 }
 0x29d   :  { %v652_v43 = vmul.f32 %v1080_v41, %v632_v42 }
 0x29f   :  { %668 = vadd.xlane.f32.xlu1 %v652_v43 }
 0x2a0   :  { %v587_v44 = vpop.f32.mrf.mxu3 }
 0x2a1   :  { %v588_v45 = vadd.f32 %v1074_v38, %v587_v44 }
 0x2a3   :  { %v633_v46 = vmax.f32 %v588_v45, 0.0 }
 0x2a5   :  { %v653_v48 = vmul.f32 %v1080_v41, %v633_v46 }
 0x2a7   :  { %670 = vadd.xlane.f32.xlu2 %v653_v48 }
 0x2a8   :  { %v590_v49 = vpop.f32.mrf.mxu3 }
 0x2a9   :  { %v591_v50 = vadd.f32 %v1074_v38, %v590_v49 }
 0x2ab   :  { %v634_v47 = vmax.f32 %v591_v50, 0.0 }
 0x2ad   :  { %v654_v52 = vmul.f32 %v1080_v41, %v634_v47 }
 0x2af   :  { %672 = vadd.xlane.f32.xlu0 %v654_v52 }
 0x2b0   :  { %v593_v54 = vpop.f32.mrf.mxu3 }
 0x2b1   :  { %v594_v55 = vadd.f32 %v1074_v38, %v593_v54 }
 0x2b3   :  { %v635_v57 = vmax.f32 %v594_v55, 0.0 }
 0x2b5   :  { %v655_v58 = vmul.f32 %v1080_v41, %v635_v57 }
 0x2b7   :  { %674 = vadd.xlane.f32.xlu2 %v655_v58 }
 0x2b8   :  { %v596_v59 = vpop.f32.mrf.mxu3 }
 0x2b9   :  { %v597_v56 = vadd.f32 %v1074_v38, %v596_v59 }
 0x2bb   :  { %v636_v60 = vmax.f32 %v597_v56, 0.0 }
 0x2bd   :  { %v656_v51 = vmul.f32 %v1080_v41, %v636_v60 }
 0x2bf   :  { %676 = vadd.xlane.f32.xlu1 %v656_v51 }
 0x2c0   :  { %v599_v61 = vpop.f32.mrf.mxu3 }
 0x2c1   :  { %v600_v62 = vadd.f32 %v1074_v38, %v599_v61 }
 0x2c3   :  { %v637_v63 = vmax.f32 %v600_v62, 0.0 }
 0x2c5   :  { %v657_v0 = vmul.f32 %v1080_v41, %v637_v63 }
 0x2c7   :  { %678 = vadd.xlane.f32.xlu2 %v657_v0 }
 0x2c8   :  { %v602_v53 = vpop.f32.mrf.mxu3 }
 0x2c9   :  { %v603_v1 = vadd.f32 %v1074_v38, %v602_v53 }
 0x2cb   :  { %v638_v2 = vmax.f32 %v603_v1, 0.0 }
 0x2cd   :  { %v658_v3 = vmul.f32 %v1080_v41, %v638_v2 }
 0x2cf   :  { %680 = vadd.xlane.f32.xlu0 %v658_v3 }
 0x2d0   :  { %v605_v4 = vpop.f32.mrf.mxu3 }
 0x2d1   :  { %v606_v5 = vadd.f32 %v1074_v38, %v605_v4 }
 0x2d3   :  { %v639_v6 = vmax.f32 %v606_v5, 0.0 }
 0x2d5   :  { %v659_v7 = vmul.f32 %v1080_v41, %v639_v6 }
 0x2d7   :  { %682 = vadd.xlane.f32.xlu1 %v659_v7 }
 0x2d8   :  { %v608_v8 = vpop.f32.mrf.mxu3 }
 0x2d9   :  { %v609_v9 = vadd.f32 %v1074_v38, %v608_v8 }
 0x2db   :  { %v640_v10 = vmax.f32 %v609_v9, 0.0 }
 0x2dd   :  { %v660_v11 = vmul.f32 %v1080_v41, %v640_v10 }
 0x2df   :  { %684 = vadd.xlane.f32.xlu2 %v660_v11 }
 0x2e0   :  { %v611_v12 = vpop.f32.mrf.mxu3 }
 0x2e1   :  { %v612_v13 = vadd.f32 %v1074_v38, %v611_v12 }
 0x2e3   :  { %v641_v14 = vmax.f32 %v612_v13, 0.0 }
 0x2e5   :  { %v661_v15 = vmul.f32 %v1080_v41, %v641_v14 }
 0x2e7   :  { %686 = vadd.xlane.f32.xlu0 %v661_v15 }
 0x2e8   :  { %v614_v16 = vpop.f32.mrf.mxu3 }
 0x2e9   :  { %v615_v17 = vadd.f32 %v1074_v38, %v614_v16 }
 0x2eb   :  { %v642_v18 = vmax.f32 %v615_v17, 0.0 }
 0x2ed   :  { %v662_v19 = vmul.f32 %v1080_v41, %v642_v18 }
 0x2ef   :  { %688 = vadd.xlane.f32.xlu1 %v662_v19 }
 0x2f0   :  { %v617_v20 = vpop.f32.mrf.mxu3 }
 0x2f1   :  { %v618_v21 = vadd.f32 %v1074_v38, %v617_v20 }
 0x2f3   :  { %v643_v22 = vmax.f32 %v618_v21, 0.0 }
 0x2f5   :  { %v663_v23 = vmul.f32 %v1080_v41, %v643_v22 }
 0x2f7   :  { %690 = vadd.xlane.f32.xlu2 %v663_v23 }
 0x2f8   :  { %v620_v24 = vpop.f32.mrf.mxu3 }
 0x2f9   :  { %v621_v25 = vadd.f32 %v1074_v38, %v620_v24 }
 0x2fb   :  { %v644_v26 = vmax.f32 %v621_v25, 0.0 }
 0x2fd   :  { %v664_v27 = vmul.f32 %v1080_v41, %v644_v26 }
 0x2ff   :  { %692 = vadd.xlane.f32.xlu0 %v664_v27 }
 0x300   :  { %v623_v28 = vpop.f32.mrf.mxu3 }
 0x301   :  { %v624_v29 = vadd.f32 %v1074_v38, %v623_v28 }
 0x303   :  { %v645_v30 = vmax.f32 %v624_v29, 0.0 }
 0x305   :  { %v665_v31 = vmul.f32 %v1080_v41, %v645_v30 }
 0x307   :  { %694 = vadd.xlane.f32.xlu1 %v665_v31 }
 0x308   :  { %v626_v32 = vpop.f32.mrf.mxu3 }
 0x309   :  { %v627_v33 = vadd.f32 %v1074_v38, %v626_v32 }
 0x30b   :  { %v646_v34 = vmax.f32 %v627_v33, 0.0 }
 0x30d   :  { %v666_v35 = vmul.f32 %v1080_v41, %v646_v34 }
 0x30f   :  { %696 = vadd.xlane.f32.xlu2 %v666_v35 }
 0x310   :  { %v629_v36 = vpop.f32.mrf.mxu3 }
 0x311   :  { %v630_v39 = vadd.f32 %v1074_v38, %v629_v36 }
 0x312   :  { %v669_v40 = vpop.xlane.xlu1 %668 }
 0x313   :  { %v647_v42 = vmax.f32 %v630_v39, 0.0  ;;  %v702_v43 = vadd.f32 %v701_v37, %v669_v40 }
 0x315   :  { %719 = vst.msk [vmem:[%s1193_s13] sm:$0xff] %vm718_vm0, %v702_v43  ;;  %v667_v44 = vmul.f32 %v1080_v41, %v647_v42 }
 0x317   :  { %698 = vadd.xlane.f32.xlu0 %v667_v44 }
 0x31a   :  { %v671_v45 = vpop.xlane.xlu2 %670 }
 0x31b   :  { %v703_v46 = vadd.f32 %v701_v37, %v671_v45 }
 0x31d   :  { %720 = vst.msk [vmem:[%s1193_s13 + $0x8] sm:$0xff] %vm718_vm0, %v703_v46 }
 0x322   :  { %v673_v38 = vpop.xlane.xlu0 %672 }
 0x323   :  { %v704_v48 = vadd.f32 %v701_v37, %v673_v38 }
 0x325   :  { %721 = vst.msk [vmem:[%s1193_s13 + $0x10] sm:$0xff] %vm718_vm0, %v704_v48 }
 0x32a   :  { %v675_v49 = vpop.xlane.xlu2 %674 }
 0x32b   :  { %v705_v50 = vadd.f32 %v701_v37, %v675_v49 }
 0x32d   :  { %722 = vst.msk [vmem:[%s1193_s13 + $0x18] sm:$0xff] %vm718_vm0, %v705_v50 }
 0x332   :  { %v677_v41 = vpop.xlane.xlu1 %676 }
 0x333   :  { %v706_v47 = vadd.f32 %v701_v37, %v677_v41 }
 0x335   :  { %723 = vst.msk [vmem:[%s1193_s13 + $0x20] sm:$0xff] %vm718_vm0, %v706_v47 }
 0x33a   :  { %v679_v52 = vpop.xlane.xlu2 %678 }
 0x33b   :  { %v707_v54 = vadd.f32 %v701_v37, %v679_v52 }
 0x33d   :  { %724 = vst.msk [vmem:[%s1193_s13 + $0x28] sm:$0xff] %vm718_vm0, %v707_v54 }
 0x342   :  { %v681_v55 = vpop.xlane.xlu0 %680 }
 0x343   :  { %v708_v57 = vadd.f32 %v701_v37, %v681_v55 }
 0x345   :  { %725 = vst.msk [vmem:[%s1193_s13 + $0x30] sm:$0xff] %vm718_vm0, %v708_v57 }
 0x34a   :  { %v683_v58 = vpop.xlane.xlu1 %682 }
 0x34b   :  { %v709_v59 = vadd.f32 %v701_v37, %v683_v58 }
 0x34d   :  { %726 = vst.msk [vmem:[%s1193_s13 + $0x38] sm:$0xff] %vm718_vm0, %v709_v59 }
 0x352   :  { %v685_v56 = vpop.xlane.xlu2 %684 }
 0x353   :  { %v710_v60 = vadd.f32 %v701_v37, %v685_v56 }
 0x355   :  { %727 = vst.msk [vmem:[%s1193_s13 + $0x40] sm:$0xff] %vm718_vm0, %v710_v60 }
 0x35a   :  { %v687_v51 = vpop.xlane.xlu0 %686 }
 0x35b   :  { %v711_v61 = vadd.f32 %v701_v37, %v687_v51 }
 0x35d   :  { %728 = vst.msk [vmem:[%s1193_s13 + $0x48] sm:$0xff] %vm718_vm0, %v711_v61 }
 0x362   :  { %v689_v62 = vpop.xlane.xlu1 %688 }
 0x363   :  { %v712_v63 = vadd.f32 %v701_v37, %v689_v62 }
 0x365   :  { %729 = vst.msk [vmem:[%s1193_s13 + $0x50] sm:$0xff] %vm718_vm0, %v712_v63 }
 0x36a   :  { %v691_v0 = vpop.xlane.xlu2 %690 }
 0x36b   :  { %v713_v53 = vadd.f32 %v701_v37, %v691_v0 }
 0x36d   :  { %730 = vst.msk [vmem:[%s1193_s13 + $0x58] sm:$0xff] %vm718_vm0, %v713_v53 }
 0x372   :  { %v693_v1 = vpop.xlane.xlu0 %692 }
 0x373   :  { %v714_v2 = vadd.f32 %v701_v37, %v693_v1 }
 0x375   :  { %731 = vst.msk [vmem:[%s1193_s13 + $0x60] sm:$0xff] %vm718_vm0, %v714_v2 }
 0x37a   :  { %v695_v3 = vpop.xlane.xlu1 %694 }
 0x37b   :  { %v715_v4 = vadd.f32 %v701_v37, %v695_v3 }
 0x37d   :  { %732 = vst.msk [vmem:[%s1193_s13 + $0x68] sm:$0xff] %vm718_vm0, %v715_v4 }
 0x382   :  { %v697_v5 = vpop.xlane.xlu2 %696 }
 0x383   :  { %v716_v6 = vadd.f32 %v701_v37, %v697_v5 }
 0x385   :  { %733 = vst.msk [vmem:[%s1193_s13 + $0x70] sm:$0xff] %vm718_vm0, %v716_v6 }
 0x38a   :  { %v699_v7 = vpop.xlane.xlu0 %698 }
 0x38b   :  { %v717_v8 = vadd.f32 %v701_v37, %v699_v7 }
 0x38d   :  { %734 = vst.msk [vmem:[%s1193_s13 + $0x78] sm:$0xff] %vm718_vm0, %v717_v8 }
 0x38e   :  { %739 = vsyncpa [#allocation4], 1 }
 0x38f   :  { %740 = vsyncpa [#allocation6], 1 }

</bundles_post_ra>
